<compile_context>
chip_gen: v7x
topology: tpu7x:2x2x1
jax: 0.10.0
libtpu: 0.0.40
codegen_flags: <defaults>
</compile_context>

<pallas_src>
import jax
import jax.numpy as jnp
from jax.experimental import pallas as pl
from jax.experimental.pallas import tpu as pltpu

NEGATIVE_SLOPE = 0.49
K = 3
KK = K * K          # 9
R = KK * KK         # 81 fused output values per input pixel
TM = 256            # pixels per grid step (lane axis)


def _leaky(v, ns):
    return jnp.where(v > 0, v, v * ns)


def _fused_kernel(x_ref, a0_ref, a1_ref, c0_ref, c1_ref, b_ref, o_ref):
    # x_ref : (1, TM)  VMEM  input pixels (pixels on the lane axis)
    # a*_ref: (R, 1)   VMEM  layer-1 weight column per fused row (mid-channel 0/1)
    # c*_ref: (R, 1)   VMEM  layer-2 weight column per fused row (mid-channel 0/1)
    # b_ref : (3,)     SMEM  [b1[0], b1[1], b2[0]]
    # o_ref : (R, TM)  VMEM  fused output rows (pixels on the lane axis)
    ns = NEGATIVE_SLOPE
    rows, tm = o_ref.shape

    # pixel value per output column, broadcast over the 81 fused rows
    s = jnp.broadcast_to(x_ref[...], (rows, tm))             # (R, TM)

    # layer 1 (two mid channels) + LeakyReLU  — pure VPU broadcast-MAC
    u0 = _leaky(a0_ref[...] * s + b_ref[0], ns)              # (R, TM)
    u1 = _leaky(a1_ref[...] * s + b_ref[1], ns)              # (R, TM)

    # layer 2 (2-term contraction over mid channels) + LeakyReLU
    y = u0 * c0_ref[...] + u1 * c1_ref[...] + b_ref[2]
    o_ref[...] = _leaky(y, ns)


def model_forward(x, params):
    w1, b1, w2, b2 = params
    N, Cin, H, W = x.shape
    assert Cin == 1 and w1.shape == (1, 2, K, K) and w2.shape == (2, 1, K, K)

    M = N * H * W
    Mp = pl.cdiv(M, TM) * TM

    # pixels on lanes (channel dim is 1, so a plain reshape is the right order)
    x_flat = x.reshape(1, M).astype(jnp.float32)
    if Mp != M:
        x_flat = jnp.pad(x_flat, ((0, 0), (0, Mp - M)))

    # Per-fused-row weight columns, row index r = (kh*3+kw)*9 + (kh2*3+kw2).
    w1f = w1.reshape(2, KK).astype(jnp.float32)   # [mid_ch, kh*3+kw]
    w2f = w2.reshape(2, KK).astype(jnp.float32)   # [mid_ch, kh2*3+kw2]
    a0 = jnp.repeat(w1f[0], KK).reshape(R, 1)     # depends on (kh, kw)
    a1 = jnp.repeat(w1f[1], KK).reshape(R, 1)
    c0 = jnp.tile(w2f[0], KK).reshape(R, 1)       # depends on (kh2, kw2)
    c1 = jnp.tile(w2f[1], KK).reshape(R, 1)
    bias = jnp.concatenate([b1.reshape(-1), b2.reshape(-1)]).astype(jnp.float32)  # (3,)

    grid = (Mp // TM,)
    col_spec = pl.BlockSpec((R, 1), lambda i: (0, 0))

    y_flat = pl.pallas_call(
        _fused_kernel,
        out_shape=jax.ShapeDtypeStruct((R, Mp), jnp.float32),
        grid_spec=pltpu.PrefetchScalarGridSpec(
            num_scalar_prefetch=0,
            grid=grid,
            in_specs=[
                pl.BlockSpec((1, TM), lambda i: (0, i)),                 # pixels
                col_spec, col_spec, col_spec, col_spec,                  # weight cols
                pl.BlockSpec(memory_space=pltpu.MemorySpace.SMEM),       # biases
            ],
            out_specs=pl.BlockSpec((R, TM), lambda i: (0, i)),
        ),
        compiler_params=pltpu.CompilerParams(
            dimension_semantics=("parallel",)),
    )(x_flat, a0, a1, c0, c1, bias)

    # (R, M) -> (N, 1, 9H, 9W): pure layout plumbing on a tiny tensor.
    y = y_flat[:, :M].reshape(K, K, K, K, N, H, W)      # (kh, kw, kh2, kw2, n, ih, iw)
    y = jnp.transpose(y, (4, 5, 0, 2, 6, 1, 3))         # (n, ih, kh, kh2, iw, kw, kw2)
    return y.reshape(N, 1, H * KK, W * KK)


# --- pure-JAX reference (per-layer, same disjoint-block identity) ------------
def _ref_convt_leaky(x, w, b, ns):
    N, Cin, H, W = x.shape
    Cout = w.shape[1]
    y = jnp.einsum('nchw,cokl->nohkwl', x, w) + b[None, :, None, None, None, None]
    y = y.reshape(N, Cout, H * K, W * K)
    return jnp.where(y > 0, y, y * ns)


def model_reference(x, params):
    w1, b1, w2, b2 = params
    t = _ref_convt_leaky(x, w1, b1, NEGATIVE_SLOPE)
    return _ref_convt_leaky(t, w2, b2, NEGATIVE_SLOPE)


def init_params(key):
    k1, k2, k3, k4 = jax.random.split(key, 4)
    # conv_t1: ConvTranspose2d(1, 2, 3, 3) -> weight (1, 2, 3, 3), bias (2,)
    w1 = 0.1 * jax.random.normal(k1, (1, 2, 3, 3), jnp.float32)
    b1 = 0.1 * jax.random.normal(k2, (2,), jnp.float32)
    # conv_t2: ConvTranspose2d(2, 1, 3, 3) -> weight (2, 1, 3, 3), bias (1,)
    w2 = 0.1 * jax.random.normal(k3, (2, 1, 3, 3), jnp.float32)
    b2 = 0.1 * jax.random.normal(k4, (1,), jnp.float32)
    return (w1, b1, w2, b2)


if __name__ == "__main__":
    key = jax.random.PRNGKey(0)
    pkey, xkey = jax.random.split(key)
    params = init_params(pkey)

    # x: NCHW, in_channels must be 1 for conv_t1
    x = jax.random.normal(xkey, (2, 1, 16, 16), jnp.float32)

    out = jax.jit(model_forward)(x, params)
    out = jax.block_until_ready(out)
    assert out.shape == (2, 1, 16 * 9, 16 * 9), out.shape

    ref = jax.block_until_ready(model_reference(x, params))
    assert jnp.allclose(out, ref, atol=1e-4, rtol=1e-4), "mismatch vs reference"

    print("KERNEL_OK")
</pallas_src>

<mosaic_0001>
module attributes {stable_mosaic.version = 11 : i64} {
  func.func @_fused_kernel(%arg0: i32, %arg1: memref<1x256xf32, #tpu.memory_space<vmem>>, %arg2: memref<81x1xf32, #tpu.memory_space<vmem>>, %arg3: memref<81x1xf32, #tpu.memory_space<vmem>>, %arg4: memref<81x1xf32, #tpu.memory_space<vmem>>, %arg5: memref<81x1xf32, #tpu.memory_space<vmem>>, %arg6: memref<3xf32, #tpu.memory_space<smem>>, %arg7: memref<81x256xf32, #tpu.memory_space<vmem>>) attributes {dimension_semantics = [#tpu.dimension_semantics<parallel>], iteration_bounds = array<i64: 2>, scalar_prefetch = 0 : i64, scratch_operands = 0 : i64, tpu.core_type = #tpu.core_type<tc>, window_params = [{transform_indices = @transform_0, window_bounds = array<i64: 1, 256>}, {pipeline_mode = #tpu.pipeline_mode<synchronous>, transform_indices = @transform_1, window_bounds = array<i64: 81, 1>}, {pipeline_mode = #tpu.pipeline_mode<synchronous>, transform_indices = @transform_2, window_bounds = array<i64: 81, 1>}, {pipeline_mode = #tpu.pipeline_mode<synchronous>, transform_indices = @transform_3, window_bounds = array<i64: 81, 1>}, {pipeline_mode = #tpu.pipeline_mode<synchronous>, transform_indices = @transform_4, window_bounds = array<i64: 81, 1>}, {transform_indices = @transform_5, window_bounds = array<i64: 3>}, {transform_indices = @transform_6, window_bounds = array<i64: 81, 256>}]} {
    %c0 = arith.constant 0 : index
    %c0_0 = arith.constant 0 : index
    %0 = vector.load %arg1[%c0, %c0_0] : memref<1x256xf32, #tpu.memory_space<vmem>>, vector<1x256xf32>
    %1 = vector.shape_cast %0 : vector<1x256xf32> to vector<1x256xf32>
    %2 = vector.broadcast %1 : vector<1x256xf32> to vector<81x256xf32>
    %c0_1 = arith.constant 0 : index
    %c0_2 = arith.constant 0 : index
    %3 = vector.load %arg2[%c0_1, %c0_2] : memref<81x1xf32, #tpu.memory_space<vmem>>, vector<81x1xf32>
    %4 = vector.broadcast %3 : vector<81x1xf32> to vector<81x256xf32>
    %5 = arith.mulf %4, %2 : vector<81x256xf32>
    %c0_3 = arith.constant 0 : index
    %6 = memref.load %arg6[%c0_3] : memref<3xf32, #tpu.memory_space<smem>>
    %7 = vector.broadcast %6 : f32 to vector<81x256xf32>
    %8 = arith.addf %5, %7 : vector<81x256xf32>
    %cst = arith.constant 0.000000e+00 : f32
    %9 = vector.broadcast %cst : f32 to vector<81x256xf32>
    %10 = arith.cmpf ogt, %8, %9 : vector<81x256xf32>
    %cst_4 = arith.constant 4.900000e-01 : f32
    %11 = vector.broadcast %cst_4 : f32 to vector<81x256xf32>
    %12 = arith.mulf %8, %11 : vector<81x256xf32>
    %13 = arith.select %10, %8, %12 : vector<81x256xi1>, vector<81x256xf32>
    %c0_5 = arith.constant 0 : index
    %c0_6 = arith.constant 0 : index
    %14 = vector.load %arg3[%c0_5, %c0_6] : memref<81x1xf32, #tpu.memory_space<vmem>>, vector<81x1xf32>
    %15 = vector.broadcast %14 : vector<81x1xf32> to vector<81x256xf32>
    %16 = arith.mulf %15, %2 : vector<81x256xf32>
    %c1 = arith.constant 1 : index
    %17 = memref.load %arg6[%c1] : memref<3xf32, #tpu.memory_space<smem>>
    %18 = vector.broadcast %17 : f32 to vector<81x256xf32>
    %19 = arith.addf %16, %18 : vector<81x256xf32>
    %cst_7 = arith.constant 0.000000e+00 : f32
    %20 = vector.broadcast %cst_7 : f32 to vector<81x256xf32>
    %21 = arith.cmpf ogt, %19, %20 : vector<81x256xf32>
    %cst_8 = arith.constant 4.900000e-01 : f32
    %22 = vector.broadcast %cst_8 : f32 to vector<81x256xf32>
    %23 = arith.mulf %19, %22 : vector<81x256xf32>
    %24 = arith.select %21, %19, %23 : vector<81x256xi1>, vector<81x256xf32>
    %c0_9 = arith.constant 0 : index
    %c0_10 = arith.constant 0 : index
    %25 = vector.load %arg4[%c0_9, %c0_10] : memref<81x1xf32, #tpu.memory_space<vmem>>, vector<81x1xf32>
    %26 = vector.broadcast %25 : vector<81x1xf32> to vector<81x256xf32>
    %27 = arith.mulf %13, %26 : vector<81x256xf32>
    %c0_11 = arith.constant 0 : index
    %c0_12 = arith.constant 0 : index
    %28 = vector.load %arg5[%c0_11, %c0_12] : memref<81x1xf32, #tpu.memory_space<vmem>>, vector<81x1xf32>
    %29 = vector.broadcast %28 : vector<81x1xf32> to vector<81x256xf32>
    %30 = arith.mulf %24, %29 : vector<81x256xf32>
    %31 = arith.addf %27, %30 : vector<81x256xf32>
    %c2 = arith.constant 2 : index
    %32 = memref.load %arg6[%c2] : memref<3xf32, #tpu.memory_space<smem>>
    %33 = vector.broadcast %32 : f32 to vector<81x256xf32>
    %34 = arith.addf %31, %33 : vector<81x256xf32>
    %cst_13 = arith.constant 0.000000e+00 : f32
    %35 = vector.broadcast %cst_13 : f32 to vector<81x256xf32>
    %36 = arith.cmpf ogt, %34, %35 : vector<81x256xf32>
    %cst_14 = arith.constant 4.900000e-01 : f32
    %37 = vector.broadcast %cst_14 : f32 to vector<81x256xf32>
    %38 = arith.mulf %34, %37 : vector<81x256xf32>
    %39 = arith.select %36, %34, %38 : vector<81x256xi1>, vector<81x256xf32>
    %c0_15 = arith.constant 0 : index
    %c0_16 = arith.constant 0 : index
    %40 = vector.load %arg7[%c0_15, %c0_16] : memref<81x256xf32, #tpu.memory_space<vmem>>, vector<81x256xf32>
    tpu.vector_store %arg7[%c0_15, %c0_16], %39 {strides = array<i32>} : memref<81x256xf32, #tpu.memory_space<vmem>>, vector<81x256xf32>,
    return
  }
  func.func @transform_0(%arg0: i32) -> (i32, i32) {
    %c0_i32 = arith.constant 0 : i32
    %c0_i32_0 = arith.constant 0 : i32
    return %c0_i32, %arg0 : i32, i32
  }
  func.func @transform_1(%arg0: i32) -> (i32, i32) {
    %c0_i32 = arith.constant 0 : i32
    %c0_i32_0 = arith.constant 0 : i32
    %c0_i32_1 = arith.constant 0 : i32
    return %c0_i32, %c0_i32_0 : i32, i32
  }
  func.func @transform_2(%arg0: i32) -> (i32, i32) {
    %c0_i32 = arith.constant 0 : i32
    %c0_i32_0 = arith.constant 0 : i32
    %c0_i32_1 = arith.constant 0 : i32
    return %c0_i32, %c0_i32_0 : i32, i32
  }
  func.func @transform_3(%arg0: i32) -> (i32, i32) {
    %c0_i32 = arith.constant 0 : i32
    %c0_i32_0 = arith.constant 0 : i32
    %c0_i32_1 = arith.constant 0 : i32
    return %c0_i32, %c0_i32_0 : i32, i32
  }
  func.func @transform_4(%arg0: i32) -> (i32, i32) {
    %c0_i32 = arith.constant 0 : i32
    %c0_i32_0 = arith.constant 0 : i32
    %c0_i32_1 = arith.constant 0 : i32
    return %c0_i32, %c0_i32_0 : i32, i32
  }
  func.func @transform_5(%arg0: i32) -> i32 {
    %c0_i32 = arith.constant 0 : i32
    %c0_i32_0 = arith.constant 0 : i32
    return %c0_i32 : i32
  }
  func.func @transform_6(%arg0: i32) -> (i32, i32) {
    %c0_i32 = arith.constant 0 : i32
    %c0_i32_0 = arith.constant 0 : i32
    return %c0_i32, %arg0 : i32, i32
  }
}

</mosaic_0001>

<bundles_post_ra>
// kernel: squeeze.2
= control target key start
LH: loop header
LB: loop body
LE: loop exit
PB: predicated region body
PF: predicated region fallthrough
CT: control target
= control target key end

     0   :  { %vm7_vm0 = vcmask 23552   ;;  %s30_s8 = smov 3   ;;  %vm13_vm1 = vcmask 72752   ;;  %vm19_vm2 = vcmask 48152   ;;  %s47_s0 = inlined_call_operand.vmem [shape: f32[3,3], index: 0, kind: input, shape index: {}]   ;;  %s48_s1 = inlined_call_operand.vmem [shape: f32[9], index: 1, kind: output, shape index: {}]  }
   0x1   :  { %v4_v0 = vld [vmem:[%s47_s0] sm:$0xf]  ;;  %s29_s0 = smov 6  }
   0x2   :  { %5 = vst [vmem:[#allocation1] sm:$0xf] %v4_v0 }
   0x9   :  { %v10_v1 = vld [vmem:[#allocation1 + $0x2] sm:$0x1]   ;;  %v6_v2 = vld [vmem:[#allocation1] sm:$0x1]   ;;  %v16_v3 = vld [vmem:[#allocation1 + $0x1] sm:$0x1]  }
   0xa   :  { %11 = vrot.lane.b32.xlu0 %v10_v1, %s29_s0  ;;  %8 = vst.msk [vmem:[#allocation0] sm:$0x1] %vm7_vm0, %v6_v2  }
   0xe   :  { %17 = vrot.lane.b32.xlu0 %v16_v3, %s30_s8 }
  0x7c   :  { %v12_v4 = vpop.permute.xlu0 %11  }
  0x7d   :  { %14 = vst.msk [vmem:[#allocation0] sm:$0x1] %vm13_vm1, %v12_v4  }
  0x80   :  { %v18_v5 = vpop.permute.xlu0 %17  }
  0x81   :  { %20 = vst.msk [vmem:[#allocation0] sm:$0x1] %vm19_vm2, %v18_v5  }
  0x88   :  { %v24_v6 = vld [vmem:[#allocation0] sm:$0x1] }
  0x89   :  { %26 = vst [vmem:[%s48_s1] sm:$0x1] %v24_v6 }

// kernel: tile.14
= control target key start
LH: loop header
LB: loop body
LE: loop exit
PB: predicated region body
PF: predicated region fallthrough
CT: control target
= control target key end

     0   :  { %s28_s0 = inlined_call_operand.vmem [shape: f32[9], index: 0, kind: input, shape index: {}]   ;;  %s29_s1 = inlined_call_operand.vmem [shape: f32[9,9], index: 1, kind: output, shape index: {}]  }
   0x1   :  { %v4_v0 = vld [vmem:[%s28_s0] ss:$0 sm:$0xff] }
   0x2   :  { %5 = vst [vmem:[%s29_s1] sm:$0xff] %v4_v0  ;;  %8 = vst [vmem:[%s29_s1 + $0x8] sm:$0xff] %v4_v0 }

// kernel: model_forward.1
= control target key start
LH: loop header
LB: loop body
LE: loop exit
PB: predicated region body
PF: predicated region fallthrough
CT: control target
= control target key end

     0   :  { %11 = vsyncpa [#allocation3], 0  ;;  %s1200_s21 = smov 0   ;;  %s1202_s22 = smov 0   ;;  %s1980_s0 = inlined_call_operand.vmem [shape: f32[1,512], index: 0, kind: input, shape index: {}]   ;;  %s1981_s1 = inlined_call_operand.vmem [shape: f32[81,1], index: 1, kind: input, shape index: {}]   ;;  %s1982_s2 = inlined_call_operand.vmem [shape: f32[81,1], index: 2, kind: input, shape index: {}]   ;;  %s1983_s3 = inlined_call_operand.vmem [shape: f32[81,1], index: 3, kind: input, shape index: {}]   ;;  %s1984_s4 = inlined_call_operand.vmem [shape: f32[81,1], index: 4, kind: input, shape index: {}]   ;;  %s1985_s5 = inlined_call_operand.vmem [shape: f32[3], index: 5, kind: input, shape index: {}]   ;;  %s1986_s6 = inlined_call_operand.vmem [shape: f32[81,512], index: 6, kind: output, shape index: {}]  }
   0x1   :  { %s1204_s23 = smov 0  }
   0x2 LB: > { %s1213_s24 = sadd.s32 4294967295, %s1161_s23   ;;  %s1215_s25 = sadd.s32 1, %s1161_s23   ;;  %s1161_s23 = sphi %s1204_s23, %s1991_s23   ;;  %s1157_s22 = sphi %s1202_s22, %s1990_s22   ;;  %s1153_s21 = sphi %s1200_s21, %s1989_s21  }
   0x3   : > { %s152_s26 = ssub.s32 %s1161_s23, %s1215_s25  ;;  %s155_s27 = sadd.s32 1, %s1157_s22 }
   0x4   : > { %p153_p0 = scmp.eq.s32.totalorder %s152_s26, 0  ;;  %p165_p1 = scmp.ne.s32.totalorder %s1157_s22, %s1153_s21 }
   0x5   : > { %p166_p2 = scmp.eq.s32.totalorder %s1213_s24, 1  ;;  %p1068_p3 = scmp.ge.s32.totalorder %s1161_s23, 1 }
   0x6   : > { %s1223_s28 = scalar_select %p153_p0, %s1157_s22, %s155_s27  }
   0x7   : > { %p1225_p4 = por %p166_p2, %p165_p1  ;;  %p179_p5 = scmp.lt.s32.totalorder %s1161_s23, 3 }
   0x8   : > { %p1090_p6 = scmp.eq.s32.totalorder %s1213_s24, 0  ;;  %s204_s9 = sshll.u32 %s1985_s5, 4  ;;  %s205_s9 = int_to_ptr.vmem [resolvable:$true] %s204_s9 }
   0x9   : > { %p1230_p7 = pnand %p1068_p3, %p179_p5  ;;  %s1120_s10 = scalar_lea.vmem %s205_s9, 16 }
   0xa   : > { %p1121_p10 = scmp.ne.s32.totalorder %s205_s9, %s1120_s10  ;;  %p1128_p0 = scmp.lt.s32.totalorder %s205_s9, %s205_s9 }
   0xb   : > { %p1086_p8 = pneg %p1230_p7  ;;  %p1129_p1 = scmp.lt.s32.totalorder %s1120_s10, %s1120_s10 }
   0xd   : > { %p1087_p9 = pnand %p1090_p6, %p1086_p8  ;;  %p1130_p2 = por %p1129_p1, %p1128_p0 }
   0xf   : > { %p1122_p11 = pneg %p1087_p9 }
  0x11   : > { %p1123_p12 = pnand %p1122_p11, %p1121_p10 }
  0x13   : > { %p1124_p13 = pneg %p1123_p12 }
  0x15   : > { %p1131_p3 = pnand %p1130_p2, %p1124_p13 }
  0x17   : > { %1134 = shalt.err (!%p1131_p3)
}
  0x18   : > { %s1163_s11 = smov [#allocation2]   ;;  %225 = sbr.rel (%p1230_p7) target bundleno = 276 (0x114), region = 44 }
  0x19   : > { %1089 = dma.vmem_to_smem (!%p1087_p9), %s205_s9, 16, %s1163_s11, [#allocation3]  }
  0x1f   : > { %1148 = dma.done.wait (%p1090_p6), [#allocation3], 16  }
  0x20   : > { %1150 = vsyncadd (%p1090_p6), [#allocation3], 4294967280 }
  0x21   : > { %231 = sfence }
  0x22   : > { %v274_v0 = vld [vmem:[%s1981_s1 + $0x10] sm:$0xff]  ;;  %v272_v1 = vld [vmem:[%s1981_s1] sm:$0xff]  ;;  %v1164_v2 = vmov 0   ;;  %v275_v3 = vld [vmem:[%s1981_s1 + $0x18] sm:$0xff]  ;;  %s1073_s10 = sshll.u32 %s1213_s24, 1  ;;  %v262_v45 = vlaneseq  ;;  %s360_s14 = sld [smem:[#allocation2]] }
  0x23   : > { %1119 = vset.pattern.permute.xlu1 %v1164_v2  ;;  %1118 = vset.pattern.permute.xlu0 %v1164_v2  ;;  %v273_v4 = vld [vmem:[%s1981_s1 + $0x8] sm:$0xff]  ;;  %v276_v6 = vld [vmem:[%s1981_s1 + $0x20] sm:$0xff]  ;;  %v279_v7 = vld [vmem:[%s1981_s1 + $0x38] sm:$0xff]  ;;  %p255_p5 = scmp.lt.s32.totalorder %s1073_s10, 3  ;;  %s1074_s15 = sld [smem:[#allocation2 + $0x1]] }
  0x24   : > { %295 = vperm.xlu1 %1119, %v274_v0   ;;  %285 = vperm.xlu0 %1118, %v272_v1   ;;  %v277_v5 = vld [vmem:[%s1981_s1 + $0x28] sm:$0xff]  ;;  %v278_v8 = vld [vmem:[%s1981_s1 + $0x30] sm:$0xff]  ;;  %v280_v10 = vld [vmem:[%s1981_s1 + $0x40] sm:$0xff]  ;;  %v263_v46 = vshrl.u32 %v262_v45, 7  ;;  %s1075_s16 = sld [smem:[#allocation2 + $0x2]]  ;;  %s251_s17 = sand.u32 1, %s1153_s21  }
  0x25   : > { %v281_v9 = vld [vmem:[%s1981_s1 + $0x48] sm:$0xff]  ;;  %v450_v11 = vld [vmem:[%s1982_s2] sm:$0xff]  ;;  %v282_v12 = vld [vmem:[%s1981_s1 + $0x50] sm:$0x1]  ;;  %s1993_s10 = smov (!%p255_p5, %s1073_s10), 3  ;;  %s1789_s21 = smul.u32 176, %s251_s17 }
  0x26   : > { %v452_v13 = vld [vmem:[%s1982_s2 + $0x10] sm:$0xff]  ;;  %v451_v14 = vld [vmem:[%s1982_s2 + $0x8] sm:$0xff]  ;;  %v454_v15 = vld [vmem:[%s1982_s2 + $0x20] sm:$0xff]  ;;  %s257_s13 = scalar_lea.vmem %s1980_s0, %s1993_s10  ;;  %v264_v47 = vsub.s32 0, %v263_v46  ;;  %v268_v49 = vsub.s32 1, %v263_v46  ;;  %s1080_s19 = sshll.u32 (%p1225_p4), %s1213_s24, 4 }
  0x27   : > { %v453_v16 = vld [vmem:[%s1982_s2 + $0x18] sm:$0xff]  ;;  %v456_v17 = vld [vmem:[%s1982_s2 + $0x30] sm:$0xff]  ;;  %v455_v18 = vld [vmem:[%s1982_s2 + $0x28] sm:$0xff]  ;;  %s1844_s18 = scalar_lea.vmem [#allocation4], %s1789_s21  ;;  %s1927_s26 = scalar_lea.vmem (%p1225_p4), %s1986_s6, %s1080_s19 }
  0x28   : > { %300 = vperm.xlu1 %1119, %v275_v3   ;;  %290 = vperm.xlu0 %1118, %v273_v4   ;;  %v458_v19 = vld [vmem:[%s1982_s2 + $0x40] sm:$0xff]  ;;  %v457_v20 = vld [vmem:[%s1982_s2 + $0x38] sm:$0xff]  ;;  %v460_v21 = vld [vmem:[%s1982_s2 + $0x50] sm:$0x1]  ;;  %v1388_v55 = vstv %s360_s14 }
  0x29   : > { %v459_v22 = vld [vmem:[%s1982_s2 + $0x48] sm:$0xff]  ;;  %v628_v24 = vld [vmem:[%s1983_s3] sm:$0xff]  ;;  %v631_v25 = vld [vmem:[%s1983_s3 + $0x18] sm:$0xff] }
  0x2a   : > { %v629_v23 = vld [vmem:[%s1983_s3 + $0x8] sm:$0xff]  ;;  %v630_v26 = vld [vmem:[%s1983_s3 + $0x10] sm:$0xff]  ;;  %v632_v28 = vld [vmem:[%s1983_s3 + $0x20] sm:$0xff] }
  0x2b   : > { %v633_v27 = vld [vmem:[%s1983_s3 + $0x28] sm:$0xff]  ;;  %v635_v29 = vld [vmem:[%s1983_s3 + $0x38] sm:$0xff]  ;;  %v634_v30 = vld [vmem:[%s1983_s3 + $0x30] sm:$0xff] }
  0x2c   : > { %310 = vperm.xlu1 %1119, %v277_v5   ;;  %305 = vperm.xlu0 %1118, %v276_v6   ;;  %v637_v31 = vld [vmem:[%s1983_s3 + $0x48] sm:$0xff]  ;;  %v636_v32 = vld [vmem:[%s1983_s3 + $0x40] sm:$0xff]  ;;  %v638_v34 = vld [vmem:[%s1983_s3 + $0x50] sm:$0x1] }
  0x2d   : > { %v716_v33 = vld [vmem:[%s1984_s4] sm:$0xff]  ;;  %v718_v35 = vld [vmem:[%s1984_s4 + $0x10] sm:$0xff]  ;;  %v717_v36 = vld [vmem:[%s1984_s4 + $0x8] sm:$0xff] }
  0x2e   : > { %v720_v37 = vld [vmem:[%s1984_s4 + $0x20] sm:$0xff]  ;;  %v719_v38 = vld [vmem:[%s1984_s4 + $0x18] sm:$0xff]  ;;  %v722_v39 = vld [vmem:[%s1984_s4 + $0x30] sm:$0xff] }
  0x2f   : > { %v721_v40 = vld [vmem:[%s1984_s4 + $0x28] sm:$0xff]  ;;  %v724_v41 = vld [vmem:[%s1984_s4 + $0x40] sm:$0xff]  ;;  %v723_v42 = vld [vmem:[%s1984_s4 + $0x38] sm:$0xff] }
  0x30   : > { %320 = vperm.xlu1 %1119, %v279_v7   ;;  %315 = vperm.xlu0 %1118, %v278_v8   ;;  %v726_v43 = vld [vmem:[%s1984_s4 + $0x50] sm:$0x1]  ;;  %v725_v44 = vld [vmem:[%s1984_s4 + $0x48] sm:$0xff]  ;;  %v260_v48 = vld [vmem:[%s257_s13] sm:$0x3]  ;;  %v1401_v7 = vstv %s1074_s15 }
  0x31   : > { %v1383_v50 = vrot.slane %v260_v48, %v264_v47  ;;  %v1385_v51 = vrot.slane %v260_v48, %v268_v49 }
  0x34   : > { %330 = vperm.xlu1 %1119, %v281_v9   ;;  %325 = vperm.xlu0 %1118, %v280_v10  }
  0x38   : > { %463 = vperm.xlu1 %1119, %v450_v11   ;;  %335 = vperm.xlu0 %1118, %v282_v12  }
  0x3c   : > { %473 = vperm.xlu1 %1119, %v452_v13   ;;  %468 = vperm.xlu0 %1118, %v451_v14  }
  0x40   : > { %483 = vperm.xlu1 %1119, %v454_v15   ;;  %478 = vperm.xlu0 %1118, %v453_v16  }
  0x44   : > { %493 = vperm.xlu1 %1119, %v456_v17   ;;  %488 = vperm.xlu0 %1118, %v455_v18  }
  0x48   : > { %503 = vperm.xlu1 %1119, %v458_v19   ;;  %498 = vperm.xlu0 %1118, %v457_v20   ;;  %v1410_v20 = vstv %s1075_s16 }
  0x4c   : > { %513 = vperm.xlu1 %1119, %v460_v21   ;;  %508 = vperm.xlu0 %1118, %v459_v22  }
  0x50   : > { %646 = vperm.xlu1 %1119, %v629_v23   ;;  %641 = vperm.xlu0 %1118, %v628_v24  }
  0x54   : > { %656 = vperm.xlu1 %1119, %v631_v25   ;;  %651 = vperm.xlu0 %1118, %v630_v26  }
  0x58   : > { %666 = vperm.xlu1 %1119, %v633_v27   ;;  %661 = vperm.xlu0 %1118, %v632_v28  }
  0x5c   : > { %676 = vperm.xlu1 %1119, %v635_v29   ;;  %671 = vperm.xlu0 %1118, %v634_v30  }
  0x60   : > { %686 = vperm.xlu1 %1119, %v637_v31   ;;  %681 = vperm.xlu0 %1118, %v636_v32  }
  0x64   : > { %729 = vperm.xlu1 %1119, %v716_v33   ;;  %691 = vperm.xlu0 %1118, %v638_v34  }
  0x68   : > { %739 = vperm.xlu1 %1119, %v718_v35   ;;  %734 = vperm.xlu0 %1118, %v717_v36  }
  0x6c   : > { %749 = vperm.xlu1 %1119, %v720_v37   ;;  %744 = vperm.xlu0 %1118, %v719_v38  }
  0x70   : > { %759 = vperm.xlu1 %1119, %v722_v39   ;;  %754 = vperm.xlu0 %1118, %v721_v40  }
  0x74   : > { %769 = vperm.xlu1 %1119, %v724_v41   ;;  %764 = vperm.xlu0 %1118, %v723_v42  }
  0x78   : > { %779 = vperm.xlu1 %1119, %v726_v43   ;;  %774 = vperm.xlu0 %1118, %v725_v44  }
  0xa3   : > { %v296_v52 = vpop.permute.xlu1 %295  ;;  %v286_v53 = vpop.permute.xlu0 %285 }
  0xa4   : > { %v338_v54 = vmul.f32 %v286_v53, %v1383_v50  ;;  %v339_v56 = vmul.f32 %v286_v53, %v1385_v51  ;;  %v342_v62 = vmul.f32 %v296_v52, %v1383_v50  ;;  %v343_v63 = vmul.f32 %v296_v52, %v1385_v51 }
  0xa6   : > { %v362_v60 = vadd.f32 %v1388_v55, %v338_v54  ;;  %v363_v0 = vadd.f32 %v1388_v55, %v339_v56  ;;  %v366_v9 = vadd.f32 %v1388_v55, %v342_v62  ;;  %v367_v10 = vadd.f32 %v1388_v55, %v343_v63 }
  0xa7   : > { %v301_v57 = vpop.permute.xlu1 %300  ;;  %v291_v58 = vpop.permute.xlu0 %290 }
  0xa8   : > { %v340_v59 = vmul.f32 %v291_v58, %v1383_v50  ;;  %v341_v61 = vmul.f32 %v291_v58, %v1385_v51  ;;  %v344_v3 = vmul.f32 %v301_v57, %v1383_v50  ;;  %v345_v5 = vmul.f32 %v301_v57, %v1385_v51 }
  0xa9   : > { %v406_v8 = vmul.f32 0.49, %v362_v60  ;;  %vm384_vm0 = vcmp.gt.f32.partialorder %v362_v60, 0.0  ;;  %v407_v11 = vmul.f32 0.49, %v363_v0  ;;  %vm385_vm1 = vcmp.gt.f32.partialorder %v363_v0, 0.0 }
  0xaa   : > { %v364_v4 = vadd.f32 %v1388_v55, %v340_v59  ;;  %v365_v6 = vadd.f32 %v1388_v55, %v341_v61  ;;  %v368_v17 = vadd.f32 %v1388_v55, %v344_v3  ;;  %v369_v21 = vadd.f32 %v1388_v55, %v345_v5 }
  0xab   : > { %v311_v1 = vpop.permute.xlu1 %310  ;;  %v306_v2 = vpop.permute.xlu0 %305  ;;  %v1413_v23 = vsel %vm384_vm0, %v362_v60, %v406_v8  ;;  %v1415_v24 = vsel %vm385_vm1, %v363_v0, %v407_v11  ;;  %vm388_vm4 = vcmp.gt.f32.partialorder %v366_v9, 0.0  ;;  %vm389_vm5 = vcmp.gt.f32.partialorder %v367_v10, 0.0 }
  0xac   : > { %v348_v12 = vmul.f32 %v311_v1, %v1383_v50  ;;  %v349_v13 = vmul.f32 %v311_v1, %v1385_v51  ;;  %v346_v14 = vmul.f32 %v306_v2, %v1383_v50  ;;  %v347_v18 = vmul.f32 %v306_v2, %v1385_v51 }
  0xad   : > { %v408_v19 = vmul.f32 0.49, %v364_v4  ;;  %vm386_vm2 = vcmp.gt.f32.partialorder %v364_v4, 0.0  ;;  %v409_v22 = vmul.f32 0.49, %v365_v6  ;;  %vm387_vm3 = vcmp.gt.f32.partialorder %v365_v6, 0.0 }
  0xae   : > { %v372_v25 = vadd.f32 %v1388_v55, %v348_v12  ;;  %v373_v26 = vadd.f32 %v1388_v55, %v349_v13  ;;  %v1420_v27 = vadd.f32 %v1388_v55, %v346_v14  ;;  %v1424_v31 = vadd.f32 %v1388_v55, %v347_v18 }
  0xaf   : > { %v321_v15 = vpop.permute.xlu1 %320  ;;  %v316_v16 = vpop.permute.xlu0 %315  ;;  %v1429_v34 = vsel %vm386_vm2, %v364_v4, %v408_v19  ;;  %v1432_v36 = vsel %vm387_vm3, %v365_v6, %v409_v22  ;;  %v412_v37 = vmul.f32 0.49, %v368_v17  ;;  %v413_v38 = vmul.f32 0.49, %v369_v21 }
  0xb0   : > { %v352_v28 = vmul.f32 %v321_v15, %v1383_v50  ;;  %v353_v32 = vmul.f32 %v321_v15, %v1385_v51  ;;  %v350_v33 = vmul.f32 %v316_v16, %v1383_v50  ;;  %v351_v35 = vmul.f32 %v316_v16, %v1385_v51 }
  0xb1   : > { %vm390_vm6 = vcmp.gt.f32.partialorder %v368_v17, 0.0  ;;  %vm391_vm7 = vcmp.gt.f32.partialorder %v369_v21, 0.0  ;;  %v410_v39 = vmul.f32 0.49, %v366_v9  ;;  %v411_v40 = vmul.f32 0.49, %v367_v10 }
  0xb2   : > { %v376_v41 = vadd.f32 %v1388_v55, %v352_v28  ;;  %v377_v47 = vadd.f32 %v1388_v55, %v353_v32  ;;  %v374_v48 = vadd.f32 %v1388_v55, %v350_v33  ;;  %v416_v52 = vmul.f32 0.49, %v372_v25 }
  0xb3   : > { %v331_v29 = vpop.permute.xlu1 %330  ;;  %v326_v30 = vpop.permute.xlu0 %325  ;;  %v375_v53 = vadd.f32 %v1388_v55, %v351_v35  ;;  %v1442_v54 = vsel %vm390_vm6, %v368_v17, %v412_v37  ;;  %v1444_v56 = vsel %vm391_vm7, %v369_v21, %v413_v38  ;;  %vm394_vm8 = vcmp.gt.f32.partialorder %v372_v25, 0.0 }
  0xb4   : > { %v356_v42 = vmul.f32 %v331_v29, %v1383_v50  ;;  %v357_v43 = vmul.f32 %v331_v29, %v1385_v51  ;;  %v354_v44 = vmul.f32 %v326_v30, %v1383_v50  ;;  %v355_v49 = vmul.f32 %v326_v30, %v1385_v51 }
  0xb5   : > { %v1447_v57 = vsel %vm388_vm4, %v366_v9, %v410_v39  ;;  %v1450_v58 = vsel %vm389_vm5, %v367_v10, %v411_v40  ;;  %vm395_vm9 = vcmp.gt.f32.partialorder %v373_v26, 0.0  ;;  %v417_v59 = vmul.f32 0.49, %v373_v26 }
  0xb6   : > { %v1453_v60 = vadd.f32 %v1388_v55, %v356_v42  ;;  %v1456_v61 = vadd.f32 %v1388_v55, %v357_v43  ;;  %v1459_v62 = vadd.f32 %v1388_v55, %v354_v44  ;;  %v1463_v2 = vadd.f32 %v1388_v55, %v355_v49 }
  0xb7   : > { %v464_v45 = vpop.permute.xlu1 %463  ;;  %v336_v46 = vpop.permute.xlu0 %335  ;;  %v1467_v5 = vsel %vm394_vm8, %v372_v25, %v416_v52  ;;  %vm392_vm10 = vcmp.gt.f32.partialorder %v1420_v27, 0.0  ;;  %vm393_vm11 = vcmp.gt.f32.partialorder %v1424_v31, 0.0  ;;  %v414_v8 = vmul.f32 0.49, %v1420_v27 }
  0xb8   : > { %v516_v63 = vmul.f32 %v464_v45, %v1383_v50  ;;  %v517_v3 = vmul.f32 %v464_v45, %v1385_v51  ;;  %v358_v4 = vmul.f32 %v336_v46, %v1383_v50  ;;  %v359_v6 = vmul.f32 %v336_v46, %v1385_v51 }
  0xb9   : > { %v1474_v9 = vsel %vm395_vm9, %v373_v26, %v417_v59  ;;  %v415_v10 = vmul.f32 0.49, %v1424_v31  ;;  %vm398_vm12 = vcmp.gt.f32.partialorder %v376_v41, 0.0  ;;  %v420_v11 = vmul.f32 0.49, %v376_v41 }
  0xba   : > { %v1478_v12 = vadd.f32 %v1401_v7, %v516_v63  ;;  %v1484_v18 = vadd.f32 %v1401_v7, %v517_v3  ;;  %v1487_v19 = vadd.f32 %v1388_v55, %v358_v4  ;;  %v421_v22 = vmul.f32 0.49, %v377_v47 }
  0xbb   : > { %v474_v0 = vpop.permute.xlu1 %473  ;;  %v469_v1 = vpop.permute.xlu0 %468  ;;  %v1491_v25 = vadd.f32 %v1388_v55, %v359_v6  ;;  %v1496_v26 = vsel %vm392_vm10, %v1420_v27, %v414_v8  ;;  %vm399_vm13 = vcmp.gt.f32.partialorder %v377_v47, 0.0  ;;  %v418_v28 = vmul.f32 0.49, %v374_v48 }
  0xbc   : > { %v520_v13 = vmul.f32 %v474_v0, %v1383_v50  ;;  %v521_v14 = vmul.f32 %v474_v0, %v1385_v51  ;;  %v518_v15 = vmul.f32 %v469_v1, %v1383_v50  ;;  %v519_v21 = vmul.f32 %v469_v1, %v1385_v51 }
  0xbd   : > { %v1501_v29 = vsel %vm393_vm11, %v1424_v31, %v415_v10  ;;  %v1504_v30 = vsel %vm398_vm12, %v376_v41, %v420_v11  ;;  %vm396_vm14 = vcmp.gt.f32.partialorder %v374_v48, 0.0  ;;  %v419_v32 = vmul.f32 0.49, %v375_v53 }
  0xbe   : > { %v1507_v55 = vadd.f32 %v1401_v7, %v520_v13  ;;  %v1510_v33 = vadd.f32 %v1401_v7, %v521_v14  ;;  %v1513_v27 = vadd.f32 %v1401_v7, %v518_v15  ;;  %vm397_vm15 = vcmp.gt.f32.partialorder %v375_v53, 0.0 }
  0xbf   : > { %v484_v16 = vpop.permute.xlu1 %483  ;;  %v479_v17 = vpop.permute.xlu0 %478  ;;  %v1516_v31 = vadd.f32 %v1401_v7, %v519_v21  ;;  %v1520_v40 = vsel %vm399_vm13, %v377_v47, %v421_v22  ;;  %v1524_v43 = vsel %vm396_vm14, %v374_v48, %v418_v28  ;;  %vm402_vm0 = vcmp.gt.f32.partialorder %v1453_v60, 0.0 }
  0xc0   : > { %v524_v38 = vmul.f32 %v484_v16, %v1383_v50  ;;  %v525_v39 = vmul.f32 %v484_v16, %v1385_v51  ;;  %v522_v41 = vmul.f32 %v479_v17, %v1383_v50  ;;  %v523_v42 = vmul.f32 %v479_v17, %v1385_v51 }
  0xc1   : > { %v1527_v44 = vsel %vm397_vm15, %v375_v53, %v419_v32  ;;  %vm403_vm1 = vcmp.gt.f32.partialorder %v1456_v61, 0.0  ;;  %v424_v45 = vmul.f32 0.49, %v1453_v60  ;;  %v425_v46 = vmul.f32 0.49, %v1456_v61 }
  0xc2   : > { %v1537_v0 = vadd.f32 %v1401_v7, %v524_v38  ;;  %v1540_v53 = vadd.f32 %v1401_v7, %v525_v39  ;;  %v422_v1 = vmul.f32 0.49, %v1459_v62  ;;  %v423_v3 = vmul.f32 0.49, %v1463_v2 }
  0xc3   : > { %v494_v35 = vpop.permute.xlu1 %493  ;;  %v489_v37 = vpop.permute.xlu0 %488  ;;  %v1545_v4 = vadd.f32 %v1401_v7, %v522_v41  ;;  %v1548_v6 = vadd.f32 %v1401_v7, %v523_v42  ;;  %vm400_vm2 = vcmp.gt.f32.partialorder %v1459_v62, 0.0  ;;  %vm401_vm3 = vcmp.gt.f32.partialorder %v1463_v2, 0.0 }
  0xc4   : > { %v528_v49 = vmul.f32 %v494_v35, %v1383_v50  ;;  %v529_v47 = vmul.f32 %v494_v35, %v1385_v51  ;;  %v526_v52 = vmul.f32 %v489_v37, %v1383_v50  ;;  %v527_v59 = vmul.f32 %v489_v37, %v1385_v51 }
  0xc5   : > { %v1555_v8 = vsel %vm402_vm0, %v1453_v60, %v424_v45  ;;  %v1560_v10 = vsel %vm403_vm1, %v1456_v61, %v425_v46  ;;  %vm562_vm4 = vcmp.gt.f32.partialorder %v1478_v12, 0.0  ;;  %v584_v11 = vmul.f32 0.49, %v1478_v12 }
  0xc6   : > { %v1565_v13 = vadd.f32 %v1401_v7, %v528_v49  ;;  %v1568_v14 = vadd.f32 %v1401_v7, %v529_v47  ;;  %v1571_v15 = vadd.f32 %v1401_v7, %v526_v52  ;;  %v1574_v60 = vadd.f32 %v1401_v7, %v527_v59 }
  0xc7   : > { %v504_v48 = vpop.permute.xlu1 %503  ;;  %v499_v63 = vpop.permute.xlu0 %498  ;;  %v1579_v22 = vsel %vm400_vm2, %v1459_v62, %v422_v1  ;;  %v1582_v28 = vsel %vm401_vm3, %v1463_v2, %v423_v3  ;;  %vm563_vm5 = vcmp.gt.f32.partialorder %v1484_v18, 0.0  ;;  %v585_v37 = vmul.f32 0.49, %v1484_v18 }
  0xc8   : > { %v532_v61 = vmul.f32 %v504_v48, %v1383_v50  ;;  %v533_v21 = vmul.f32 %v504_v48, %v1385_v51  ;;  %v530_v32 = vmul.f32 %v499_v63, %v1383_v50  ;;  %v531_v35 = vmul.f32 %v499_v63, %v1385_v51 }
  0xc9   : > { %v1591_v38 = vsel %vm562_vm4, %v1478_v12, %v584_v11  ;;  %vm404_vm6 = vcmp.gt.f32.partialorder %v1487_v19, 0.0  ;;  %v426_v62 = vmul.f32 0.49, %v1487_v19  ;;  %v427_v2 = vmul.f32 0.49, %v1491_v25 }
  0xca   : > { %vm405_vm7 = vcmp.gt.f32.partialorder %v1491_v25, 0.0  ;;  %v1601_v49 = vadd.f32 %v1401_v7, %v532_v61  ;;  %v1604_v12 = vadd.f32 %v1401_v7, %v533_v21  ;;  %v588_v52 = vmul.f32 0.49, %v1507_v55 }
  0xcb   : > { %v514_v16 = vpop.permute.xlu1 %513  ;;  %v509_v17 = vpop.permute.xlu0 %508  ;;  %v1609_v59 = vadd.f32 %v1401_v7, %v530_v32  ;;  %v1612_v48 = vadd.f32 %v1401_v7, %v531_v35  ;;  %vm566_vm8 = vcmp.gt.f32.partialorder %v1507_v55, 0.0  ;;  %v1623_v63 = vsel %vm404_vm6, %v1487_v19, %v426_v62 }
  0xcc   : > { %v536_v39 = vmul.f32 %v514_v16, %v1383_v50  ;;  %v537_v41 = vmul.f32 %v514_v16, %v1385_v51  ;;  %v534_v42 = vmul.f32 %v509_v17, %v1383_v50  ;;  %v535_v47 = vmul.f32 %v509_v17, %v1385_v51 }
  0xcd   : > { %v1617_v50 = vsel %vm563_vm5, %v1484_v18, %v585_v37  ;;  %v1626_v51 = vsel %vm405_vm7, %v1491_v25, %v427_v2  ;;  %vm567_vm9 = vcmp.gt.f32.partialorder %v1510_v33, 0.0  ;;  %v589_v1 = vmul.f32 0.49, %v1510_v33 }
  0xce   : > { %v1631_v3 = vadd.f32 %v1401_v7, %v536_v39  ;;  %v1634_v18 = vadd.f32 %v1401_v7, %v537_v41  ;;  %v1637_v11 = vadd.f32 %v1401_v7, %v534_v42  ;;  %v586_v19 = vmul.f32 0.49, %v1513_v27 }
  0xcf   : > { %v647_v45 = vpop.permute.xlu1 %646  ;;  %v642_v46 = vpop.permute.xlu0 %641  ;;  %v1641_v25 = vadd.f32 %v1401_v7, %v535_v47  ;;  %v1644_v61 = vsel %vm566_vm8, %v1507_v55, %v588_v52  ;;  %vm564_vm10 = vcmp.gt.f32.partialorder %v1513_v27, 0.0  ;;  %v587_v21 = vmul.f32 0.49, %v1516_v31 }
  0xd0   : > { %v1649_v32 = vmul.f32 %v647_v45, %v1429_v34  ;;  %v1652_v35 = vmul.f32 %v647_v45, %v1432_v36  ;;  %v1655_v37 = vmul.f32 %v642_v46, %v1413_v23  ;;  %vm565_vm11 = vcmp.gt.f32.partialorder %v1516_v31, 0.0 }
  0xd1   : > { %v1659_v7 = vmul.f32 %v642_v46, %v1415_v24  ;;  %v1664_v55 = vsel %vm567_vm9, %v1510_v33, %v589_v1  ;;  %vm570_vm12 = vcmp.gt.f32.partialorder %v1537_v0, 0.0  ;;  %v592_v34 = vmul.f32 0.49, %v1537_v0 }
  0xd2   : > { %v1669_v2 = vsel %vm564_vm10, %v1513_v27, %v586_v19  ;;  %vm571_vm13 = vcmp.gt.f32.partialorder %v1540_v53, 0.0  ;;  %v593_v23 = vmul.f32 0.49, %v1540_v53  ;;  %vm568_vm14 = vcmp.gt.f32.partialorder %v1545_v4, 0.0 }
  0xd3   : > { %v657_v16 = vpop.permute.xlu1 %656  ;;  %v652_v17 = vpop.permute.xlu0 %651  ;;  %v1675_v24 = vsel %vm565_vm11, %v1516_v31, %v587_v21  ;;  %vm569_vm15 = vcmp.gt.f32.partialorder %v1548_v6, 0.0  ;;  %v590_v33 = vmul.f32 0.49, %v1545_v4  ;;  %v591_v39 = vmul.f32 0.49, %v1548_v6 }
  0xd4   : > { %v1681_v41 = vmul.f32 %v657_v16, %v1442_v54  ;;  %v1684_v27 = vmul.f32 %v657_v16, %v1444_v56  ;;  %v1687_v42 = vmul.f32 %v652_v17, %v1447_v57  ;;  %v1690_v45 = vmul.f32 %v652_v17, %v1450_v58 }
  0xd5   : > { %v1695_v31 = vsel %vm570_vm12, %v1537_v0, %v592_v34  ;;  %v596_v46 = vmul.f32 0.49, %v1565_v13  ;;  %v597_v47 = vmul.f32 0.49, %v1568_v14  ;;  %v594_v54 = vmul.f32 0.49, %v1571_v15 }
  0xd6   : > { %vm574_vm0 = vcmp.gt.f32.partialorder %v1565_v13, 0.0  ;;  %vm575_vm1 = vcmp.gt.f32.partialorder %v1568_v14, 0.0  ;;  %vm572_vm2 = vcmp.gt.f32.partialorder %v1571_v15, 0.0  ;;  %v595_v57 = vmul.f32 0.49, %v1574_v60 }
  0xd7   : > { %v667_v62 = vpop.permute.xlu1 %666  ;;  %v662_v36 = vpop.permute.xlu0 %661  ;;  %v1707_v58 = vsel %vm571_vm13, %v1540_v53, %v593_v23  ;;  %v1712_v0 = vsel %vm568_vm14, %v1545_v4, %v590_v33  ;;  %v1717_v1 = vsel %vm569_vm15, %v1548_v6, %v591_v39  ;;  %vm573_vm3 = vcmp.gt.f32.partialorder %v1574_v60, 0.0 }
  0xd8   : > { %v1721_v16 = vmul.f32 %v667_v62, %v1467_v5  ;;  %v1724_v17 = vmul.f32 %v667_v62, %v1474_v9  ;;  %v1727_v53 = vmul.f32 %v662_v36, %v1496_v26  ;;  %v1730_v19 = vmul.f32 %v662_v36, %v1501_v29 }
  0xd9   : > { %v1733_v4 = vsel %vm574_vm0, %v1565_v13, %v596_v46  ;;  %v1736_v6 = vsel %vm575_vm1, %v1568_v14, %v597_v47  ;;  %v1739_v21 = vsel %vm572_vm2, %v1571_v15, %v594_v54  ;;  %v600_v5 = vmul.f32 0.49, %v1601_v49 }
  0xda   : > { %v1743_v26 = vsel %vm573_vm3, %v1574_v60, %v595_v57  ;;  %vm578_vm4 = vcmp.gt.f32.partialorder %v1601_v49, 0.0  ;;  %vm579_vm5 = vcmp.gt.f32.partialorder %v1604_v12, 0.0  ;;  %v601_v29 = vmul.f32 0.49, %v1604_v12 }
  0xdb   : > { %v677_v52 = vpop.permute.xlu1 %676  ;;  %v672_v56 = vpop.permute.xlu0 %671  ;;  %vm576_vm6 = vcmp.gt.f32.partialorder %v1609_v59, 0.0  ;;  %vm577_vm7 = vcmp.gt.f32.partialorder %v1612_v48, 0.0  ;;  %v598_v14 = vmul.f32 0.49, %v1609_v59  ;;  %v599_v36 = vmul.f32 0.49, %v1612_v48 }
  0xdc   : > { %v1749_v13 = vmul.f32 %v677_v52, %v1504_v30  ;;  %v1755_v15 = vmul.f32 %v677_v52, %v1520_v40  ;;  %v1758_v60 = vmul.f32 %v672_v56, %v1524_v43  ;;  %v1761_v62 = vmul.f32 %v672_v56, %v1527_v44 }
  0xdd   : > { %v1766_v30 = vsel %vm578_vm4, %v1601_v49, %v600_v5  ;;  %vm582_vm8 = vcmp.gt.f32.partialorder %v1631_v3, 0.0  ;;  %vm583_vm9 = vcmp.gt.f32.partialorder %v1634_v18, 0.0  ;;  %v604_v23 = vmul.f32 0.49, %v1631_v3 }
  0xde   : > { %v1774_v43 = vsel %vm579_vm5, %v1604_v12, %v601_v29  ;;  %v605_v44 = vmul.f32 0.49, %v1634_v18  ;;  %v602_v39 = vmul.f32 0.49, %v1637_v11  ;;  %v603_v49 = vmul.f32 0.49, %v1641_v25 }
  0xdf   : > { %v687_v9 = vpop.permute.xlu1 %686  ;;  %v682_v34 = vpop.permute.xlu0 %681  ;;  %vm580_vm10 = vcmp.gt.f32.partialorder %v1637_v11, 0.0  ;;  %vm581_vm11 = vcmp.gt.f32.partialorder %v1641_v25, 0.0  ;;  %v1794_v52 = vsel %vm576_vm6, %v1609_v59, %v598_v14  ;;  %v1812_v59 = vsel %vm582_vm8, %v1631_v3, %v604_v23 }
  0xe0   : > { %v1784_v54 = vmul.f32 %v687_v9, %v1555_v8  ;;  %v1787_v12 = vmul.f32 %v687_v9, %v1560_v10  ;;  %v1805_v8 = vmul.f32 %v682_v34, %v1582_v28  ;;  %v1823_v28 = vsel %vm581_vm11, %v1641_v25, %v603_v49 }
  0xe3   : > { %v730_v40 = vpop.permute.xlu1 %729  ;;  %v692_v33 = vpop.permute.xlu0 %691 }
  0xe4   : > { %v782_v46 = vmul.f32 %v730_v40, %v1591_v38  ;;  %v783_v47 = vmul.f32 %v730_v40, %v1617_v50  ;;  %v1799_v38 = vsel %vm577_vm7, %v1612_v48, %v599_v36  ;;  %v1802_v50 = vmul.f32 %v682_v34, %v1579_v22 }
  0xe5   : > { %v1817_v48 = vsel %vm583_vm9, %v1634_v18, %v605_v44  ;;  %v1820_v22 = vsel %vm580_vm10, %v1637_v11, %v602_v39  ;;  %v1830_v34 = vmul.f32 %v692_v33, %v1623_v63  ;;  %v1833_v18 = vmul.f32 %v692_v33, %v1626_v51 }
  0xe6   : > { %v804_v10 = vadd.f32 %v782_v46, %v1655_v37  ;;  %v805_v56 = vadd.f32 %v783_v47, %v1659_v7 }
  0xe7   : > { %v740_v57 = vpop.permute.xlu1 %739  ;;  %v735_v5 = vpop.permute.xlu0 %734 }
  0xe8   : > { %v828_v37 = vadd.f32 %v1410_v20, %v804_v10  ;;  %v829_v7 = vadd.f32 %v1410_v20, %v805_v56  ;;  %v786_v9 = vmul.f32 %v740_v57, %v1644_v61  ;;  %v787_v3 = vmul.f32 %v740_v57, %v1664_v55 }
  0xe9   : > { %v784_v11 = vmul.f32 %v735_v5, %v1669_v2  ;;  %v785_v25 = vmul.f32 %v735_v5, %v1675_v24 }
  0xea   : > { %vm850_vm12 = vcmp.gt.f32.partialorder %v828_v37, 0.0  ;;  %vm851_vm13 = vcmp.gt.f32.partialorder %v829_v7, 0.0  ;;  %v872_v29 = vmul.f32 0.49, %v828_v37  ;;  %v873_v14 = vmul.f32 0.49, %v829_v7 }
  0xeb   : > { %v808_v36 = vadd.f32 %v786_v9, %v1687_v42  ;;  %v809_v61 = vadd.f32 %v787_v3, %v1690_v45  ;;  %v806_v55 = vadd.f32 %v784_v11, %v1649_v32  ;;  %v807_v63 = vadd.f32 %v785_v25, %v1652_v35  ;;  %v750_v23 = vpop.permute.xlu1 %749  ;;  %v745_v51 = vpop.permute.xlu0 %744 }
  0xec   : > { %v894_v40 = vsel %vm850_vm12, %v828_v37, %v872_v29  ;;  %v895_v33 = vsel %vm851_vm13, %v829_v7, %v873_v14  ;;  %v790_v2 = vmul.f32 %v750_v23, %v1695_v31  ;;  %v791_v24 = vmul.f32 %v750_v23, %v1707_v58 }
  0xed   : > { %916 = vst [vmem:[%s1844_s18] sm:$0xff] %v894_v40  ;;  %917 = vst [vmem:[%s1844_s18 + $0x8] sm:$0xff] %v895_v33  ;;  %v832_v42 = vadd.f32 %v1410_v20, %v808_v36  ;;  %v833_v32 = vadd.f32 %v1410_v20, %v809_v61  ;;  %v830_v35 = vadd.f32 %v1410_v20, %v806_v55 }
  0xee   : > { %v831_v45 = vadd.f32 %v1410_v20, %v807_v63  ;;  %v812_v44 = vadd.f32 %v790_v2, %v1727_v53  ;;  %v813_v31 = vadd.f32 %v791_v24, %v1730_v19  ;;  %v788_v58 = vmul.f32 %v745_v51, %v1712_v0 }
  0xef   : > { %v789_v39 = vmul.f32 %v745_v51, %v1717_v1  ;;  %vm854_vm14 = vcmp.gt.f32.partialorder %v832_v42, 0.0  ;;  %vm855_vm15 = vcmp.gt.f32.partialorder %v833_v32, 0.0  ;;  %v876_v49 = vmul.f32 0.49, %v832_v42  ;;  %v760_v47 = vpop.permute.xlu1 %759  ;;  %v755_v5 = vpop.permute.xlu0 %754 }
  0xf0   : > { %v877_v46 = vmul.f32 0.49, %v833_v32  ;;  %vm852_vm0 = vcmp.gt.f32.partialorder %v830_v35, 0.0  ;;  %vm853_vm1 = vcmp.gt.f32.partialorder %v831_v45, 0.0  ;;  %v874_v10 = vmul.f32 0.49, %v830_v35 }
  0xf1   : > { %v875_v56 = vmul.f32 0.49, %v831_v45  ;;  %v898_v53 = vsel %vm854_vm14, %v832_v42, %v876_v49  ;;  %v836_v19 = vadd.f32 %v1410_v20, %v812_v44  ;;  %v837_v0 = vadd.f32 %v1410_v20, %v813_v31 }
  0xf2   : > { %v899_v57 = vsel %vm855_vm15, %v833_v32, %v877_v46  ;;  %920 = vst [vmem:[%s1844_s18 + $0x20] sm:$0xff] %v898_v53  ;;  %v896_v1 = vsel %vm852_vm0, %v830_v35, %v874_v10  ;;  %v810_v7 = vadd.f32 %v788_v58, %v1681_v41  ;;  %v811_v9 = vadd.f32 %v789_v39, %v1684_v27 }
  0xf3   : > { %921 = vst [vmem:[%s1844_s18 + $0x28] sm:$0xff] %v899_v57  ;;  %v897_v37 = vsel %vm853_vm1, %v831_v45, %v875_v56  ;;  %918 = vst [vmem:[%s1844_s18 + $0x10] sm:$0xff] %v896_v1  ;;  %vm858_vm2 = vcmp.gt.f32.partialorder %v836_v19, 0.0  ;;  %vm859_vm3 = vcmp.gt.f32.partialorder %v837_v0, 0.0  ;;  %v880_v3 = vmul.f32 0.49, %v836_v19  ;;  %v770_v63 = vpop.permute.xlu1 %769 }
  0xf4   : > { %919 = vst [vmem:[%s1844_s18 + $0x18] sm:$0xff] %v897_v37  ;;  %v881_v11 = vmul.f32 0.49, %v837_v0  ;;  %v834_v25 = vadd.f32 %v1410_v20, %v810_v7  ;;  %v835_v29 = vadd.f32 %v1410_v20, %v811_v9  ;;  %v794_v14 = vmul.f32 %v760_v47, %v1733_v4 }
  0xf5   : > { %v795_v36 = vmul.f32 %v760_v47, %v1736_v6  ;;  %v902_v61 = vsel %vm858_vm2, %v836_v19, %v880_v3  ;;  %v792_v27 = vmul.f32 %v755_v5, %v1739_v21  ;;  %v793_v55 = vmul.f32 %v755_v5, %v1743_v26  ;;  %v765_v21 = vpop.permute.xlu0 %764 }
  0xf6   : > { %v903_v41 = vsel %vm859_vm3, %v837_v0, %v881_v11  ;;  %924 = vst [vmem:[%s1844_s18 + $0x40] sm:$0xff] %v902_v61  ;;  %vm856_vm4 = vcmp.gt.f32.partialorder %v834_v25, 0.0  ;;  %vm857_vm5 = vcmp.gt.f32.partialorder %v835_v29, 0.0  ;;  %v878_v23 = vmul.f32 0.49, %v834_v25 }
  0xf7   : > { %925 = vst [vmem:[%s1844_s18 + $0x48] sm:$0xff] %v903_v41  ;;  %v879_v51 = vmul.f32 0.49, %v835_v29  ;;  %v816_v40 = vadd.f32 %v794_v14, %v1758_v60  ;;  %v817_v4 = vadd.f32 %v795_v36, %v1761_v62  ;;  %v814_v6 = vadd.f32 %v792_v27, %v1721_v16 }
  0xf8   : > { %v815_v33 = vadd.f32 %v793_v55, %v1724_v17  ;;  %v900_v2 = vsel %vm856_vm4, %v834_v25, %v878_v23  ;;  %v798_v24 = vmul.f32 %v770_v63, %v1766_v30  ;;  %v799_v42 = vmul.f32 %v770_v63, %v1774_v43  ;;  %v962_v23 = vld [vmem:[%s1844_s18 + $0x8] sm:$0xff] (%p1225_p4) }
  0xf9   : > { %v901_v26 = vsel %vm857_vm5, %v835_v29, %v879_v51  ;;  %922 = vst [vmem:[%s1844_s18 + $0x30] sm:$0xff] %v900_v2  ;;  %v840_v32 = vadd.f32 %v1410_v20, %v816_v40  ;;  %v841_v35 = vadd.f32 %v1410_v20, %v817_v4  ;;  %v838_v60 = vadd.f32 %v1410_v20, %v814_v6  ;;  %v775_v56 = vpop.permute.xlu0 %774  ;;  %v968_v4 = vld [vmem:[%s1844_s18 + $0x20] sm:$0xff] (%p1225_p4) }
  0xfa   : > { %923 = vst [vmem:[%s1844_s18 + $0x38] sm:$0xff] %v901_v26  ;;  %v839_v62 = vadd.f32 %v1410_v20, %v815_v33  ;;  %v820_v16 = vadd.f32 %v798_v24, %v1802_v50  ;;  %v821_v17 = vadd.f32 %v799_v42, %v1805_v8  ;;  %v796_v45 = vmul.f32 %v765_v21, %v1794_v52  ;;  %v780_v52 = vpop.permute.xlu1 %779  ;;  %v964_v51 = vld [vmem:[%s1844_s18 + $0x10] sm:$0xff] (%p1225_p4)  ;;  %v970_v6 = vld [vmem:[%s1844_s18 + $0x28] sm:$0xff] (%p1225_p4) }
  0xfb   : > { %v797_v30 = vmul.f32 %v765_v21, %v1799_v38  ;;  %vm862_vm6 = vcmp.gt.f32.partialorder %v840_v32, 0.0  ;;  %vm863_vm7 = vcmp.gt.f32.partialorder %v841_v35, 0.0  ;;  %v884_v43 = vmul.f32 0.49, %v840_v32  ;;  %v966_v40 = vld [vmem:[%s1844_s18 + $0x18] sm:$0xff] (%p1225_p4)  ;;  %963 = vst [vmem:[%s1927_s26 + $0x8] sm:$0xff] (%p1225_p4), %v962_v23 }
  0xfc   : > { %v885_v44 = vmul.f32 0.49, %v841_v35  ;;  %vm860_vm8 = vcmp.gt.f32.partialorder %v838_v60, 0.0  ;;  %vm861_vm9 = vcmp.gt.f32.partialorder %v839_v62, 0.0  ;;  %v882_v31 = vmul.f32 0.49, %v838_v60 }
  0xfd   : > { %v883_v58 = vmul.f32 0.49, %v839_v62  ;;  %v906_v39 = vsel %vm862_vm6, %v840_v32, %v884_v43  ;;  %v844_v8 = vadd.f32 %v1410_v20, %v820_v16  ;;  %v845_v49 = vadd.f32 %v1410_v20, %v821_v17  ;;  %965 = vst [vmem:[%s1927_s26 + $0x20] sm:$0xff] (%p1225_p4), %v964_v51  ;;  %967 = vst [vmem:[%s1927_s26 + $0x28] sm:$0xff] (%p1225_p4), %v966_v40  ;;  %v976_v2 = vld [vmem:[%s1844_s18 + $0x40] sm:$0xff] (%p1225_p4) }
  0xfe   : > { %v907_v50 = vsel %vm863_vm7, %v841_v35, %v885_v44  ;;  %928 = vst [vmem:[%s1844_s18 + $0x60] sm:$0xff] %v906_v39  ;;  %v904_v38 = vsel %vm860_vm8, %v838_v60, %v882_v31  ;;  %v818_v47 = vadd.f32 %v796_v45, %v1749_v13  ;;  %v819_v10 = vadd.f32 %v797_v30, %v1755_v15  ;;  %v978_v26 = vld [vmem:[%s1844_s18 + $0x48] sm:$0xff] (%p1225_p4) }
  0xff   : > { %929 = vst [vmem:[%s1844_s18 + $0x68] sm:$0xff] %v907_v50  ;;  %v905_v46 = vsel %vm861_vm9, %v839_v62, %v883_v58  ;;  %926 = vst [vmem:[%s1844_s18 + $0x50] sm:$0xff] %v904_v38  ;;  %vm866_vm10 = vcmp.gt.f32.partialorder %v844_v8, 0.0  ;;  %vm867_vm11 = vcmp.gt.f32.partialorder %v845_v49, 0.0  ;;  %v888_v53 = vmul.f32 0.49, %v844_v8 }
 0x100   : > { %927 = vst [vmem:[%s1844_s18 + $0x58] sm:$0xff] %v905_v46  ;;  %v889_v57 = vmul.f32 0.49, %v845_v49  ;;  %v842_v19 = vadd.f32 %v1410_v20, %v818_v47  ;;  %v843_v0 = vadd.f32 %v1410_v20, %v819_v10  ;;  %v802_v5 = vmul.f32 %v780_v52, %v1812_v59  ;;  %969 = vst [vmem:[%s1927_s26 + $0x40] sm:$0xff] (%p1225_p4), %v968_v4  ;;  %v972_v33 = vld [vmem:[%s1844_s18 + $0x30] sm:$0xff] (%p1225_p4) }
 0x101   : > { %v803_v1 = vmul.f32 %v780_v52, %v1817_v48  ;;  %v910_v13 = vsel %vm866_vm10, %v844_v8, %v888_v53  ;;  %v800_v37 = vmul.f32 %v775_v56, %v1820_v22  ;;  %v801_v7 = vmul.f32 %v775_v56, %v1823_v28  ;;  %971 = vst [vmem:[%s1927_s26 + $0x48] sm:$0xff] (%p1225_p4), %v970_v6  ;;  %v974_v21 = vld [vmem:[%s1844_s18 + $0x38] sm:$0xff] (%p1225_p4) }
 0x102   : > { %v911_v15 = vsel %vm867_vm11, %v845_v49, %v889_v57  ;;  %932 = vst [vmem:[%s1844_s18 + $0x80] sm:$0xff] %v910_v13  ;;  %vm864_vm12 = vcmp.gt.f32.partialorder %v842_v19, 0.0  ;;  %vm865_vm13 = vcmp.gt.f32.partialorder %v843_v0, 0.0  ;;  %v886_v9 = vmul.f32 0.49, %v842_v19  ;;  %973 = vst [vmem:[%s1927_s26 + $0x60] sm:$0xff] (%p1225_p4), %v972_v33 }
 0x103   : > { %933 = vst [vmem:[%s1844_s18 + $0x88] sm:$0xff] %v911_v15  ;;  %v887_v3 = vmul.f32 0.49, %v843_v0  ;;  %v824_v11 = vadd.f32 %v802_v5, %v1830_v34  ;;  %v825_v59 = vadd.f32 %v803_v1, %v1833_v18  ;;  %v822_v48 = vadd.f32 %v800_v37, %v1784_v54  ;;  %975 = vst [vmem:[%s1927_s26 + $0x68] sm:$0xff] (%p1225_p4), %v974_v21 }
 0x104   : > { %v823_v25 = vadd.f32 %v801_v7, %v1787_v12  ;;  %v908_v29 = vsel %vm864_vm12, %v842_v19, %v886_v9  ;;  %977 = vst [vmem:[%s1927_s26 + $0x80] sm:$0xff] (%p1225_p4), %v976_v2  ;;  %979 = vst [vmem:[%s1927_s26 + $0x88] sm:$0xff] (%p1225_p4), %v978_v26 }
 0x105   : > { %v909_v14 = vsel %vm865_vm13, %v843_v0, %v887_v3  ;;  %930 = vst [vmem:[%s1844_s18 + $0x70] sm:$0xff] %v908_v29  ;;  %v848_v22 = vadd.f32 %v1410_v20, %v824_v11  ;;  %v849_v28 = vadd.f32 %v1410_v20, %v825_v59  ;;  %v846_v36 = vadd.f32 %v1410_v20, %v822_v48  ;;  %944 = sbr.rel (!%p1225_p4) target bundleno = 276 (0x114), region = 52  ;;  %v984_v32 = vld [vmem:[%s1844_s18 + $0x60] sm:$0xff] (%p1225_p4) }
 0x106   : > { %931 = vst [vmem:[%s1844_s18 + $0x78] sm:$0xff] %v909_v14  ;;  %v847_v34 = vadd.f32 %v1410_v20, %v823_v25  ;;  %v960_v20 = vld [vmem:[%s1844_s18] sm:$0xff] (%p1225_p4)  ;;  %v980_v24 = vld [vmem:[%s1844_s18 + $0x50] sm:$0xff] (%p1225_p4)  ;;  %v986_v35 = vld [vmem:[%s1844_s18 + $0x68] sm:$0xff] (%p1225_p4) }
 0x107   : > { %vm870_vm14 = vcmp.gt.f32.partialorder %v848_v22, 0.0  ;;  %vm871_vm15 = vcmp.gt.f32.partialorder %v849_v28, 0.0  ;;  %v892_v54 = vmul.f32 0.49, %v848_v22  ;;  %v893_v12 = vmul.f32 0.49, %v849_v28  ;;  %961 = vst [vmem:[%s1927_s26] sm:$0xff] (%p1225_p4), %v960_v20 }
 0x108   : > { %vm868_vm0 = vcmp.gt.f32.partialorder %v846_v36, 0.0  ;;  %vm869_vm1 = vcmp.gt.f32.partialorder %v847_v34, 0.0  ;;  %v890_v18 = vmul.f32 0.49, %v846_v36  ;;  %v891_v61 = vmul.f32 0.49, %v847_v34 }
 0x109   : > { %v914_v41 = vsel %vm870_vm14, %v848_v22, %v892_v54  ;;  %v915_v27 = vsel %vm871_vm15, %v849_v28, %v893_v12  ;;  %v982_v42 = vld [vmem:[%s1844_s18 + $0x58] sm:$0xff] (%p1225_p4)  ;;  %981 = vst [vmem:[%s1927_s26 + $0xa0] sm:$0xff] (%p1225_p4), %v980_v24  ;;  %985 = vst [vmem:[%s1927_s26 + $0xc0] sm:$0xff] (%p1225_p4), %v984_v32  ;;  %v992_v16 = vld [vmem:[%s1844_s18 + $0x80] sm:$0xff] (%p1225_p4) }
 0x10a   : > { %936 = vst [vmem:[%s1844_s18 + $0xa0] sm:$0x1] %v914_v41  ;;  %937 = vst [vmem:[%s1844_s18 + $0xa8] sm:$0x1] %v915_v27  ;;  %v912_v55 = vsel %vm868_vm0, %v846_v36, %v890_v18  ;;  %v913_v63 = vsel %vm869_vm1, %v847_v34, %v891_v61  ;;  %v994_v17 = vld [vmem:[%s1844_s18 + $0x88] sm:$0xff] (%p1225_p4) }
 0x10b   : > { %934 = vst [vmem:[%s1844_s18 + $0x90] sm:$0xff] %v912_v55  ;;  %935 = vst [vmem:[%s1844_s18 + $0x98] sm:$0xff] %v913_v63 }
 0x10c   : > { %983 = vst [vmem:[%s1927_s26 + $0xa8] sm:$0xff] %v982_v42  ;;  %v988_v60 = vld [vmem:[%s1844_s18 + $0x70] sm:$0xff]  ;;  %987 = vst [vmem:[%s1927_s26 + $0xc8] sm:$0xff] %v986_v35 }
 0x10d   : > { %989 = vst [vmem:[%s1927_s26 + $0xe0] sm:$0xff] %v988_v60  ;;  %v990_v62 = vld [vmem:[%s1844_s18 + $0x78] sm:$0xff]  ;;  %993 = vst [vmem:[%s1927_s26 + $0x100] sm:$0xff] %v992_v16 }
 0x10e   : > { %991 = vst [vmem:[%s1927_s26 + $0xe8] sm:$0xff] %v990_v62  ;;  %995 = vst [vmem:[%s1927_s26 + $0x108] sm:$0xff] %v994_v17 }
 0x111   : > { %v1000_v43 = vld [vmem:[%s1844_s18 + $0xa0] sm:$0xff]  ;;  %v1002_v44 = vld [vmem:[%s1844_s18 + $0xa8] sm:$0xff] }
 0x112   : > { %v996_v45 = vld [vmem:[%s1844_s18 + $0x90] sm:$0xff]  ;;  %v998_v30 = vld [vmem:[%s1844_s18 + $0x98] sm:$0xff]  ;;  %1001 = vst [vmem:[%s1927_s26 + $0x140] sm:$0xff] %v1000_v43  ;;  %1003 = vst [vmem:[%s1927_s26 + $0x148] sm:$0xff] %v1002_v44 }
 0x113   : > { %997 = vst [vmem:[%s1927_s26 + $0x120] sm:$0xff] %v996_v45  ;;  %999 = vst [vmem:[%s1927_s26 + $0x128] sm:$0xff] %v998_v30 }
 0x114 PF: > { %p14_p4 = scmp.ge.s32.totalorder %s1215_s25, 4   ;;  %s1989_s21 = smov %s1157_s22 }
 0x115   : > { %s1990_s22 = smov %s1223_s28  ;;  %s1991_s23 = smov %s1215_s25 }
 0x116   :  { %16 = sbr.rel (!%p14_p4) target bundleno = 2 (0x2), region = 102 }
 0x11d   :  { %1019 = vsyncpa [#allocation3], 1 }
 0x11e   :  { %1021 = vsyncpa [#allocation3 + $0x1], 1 }

</bundles_post_ra>
